<compile_context>
chip_gen: v6e
topology: v6e:2x2x1
jax: 0.10.0
libtpu: 0.0.40
codegen_flags: <defaults>
</compile_context>

<pallas_src>
import jax
import jax.numpy as jnp
from jax.experimental import pallas as pl
from jax.experimental.pallas import tpu as pltpu


def _noise_kernel(w_ref, img_ref, noise_ref, out_ref):
    # w_ref:     (1,)            scalar weight (SMEM)
    # img_ref:   (1, tc, t_hw)   image tile (VMEM)
    # noise_ref: (1, 1,  t_hw)   noise tile (VMEM), broadcast over channels
    # out_ref:   (1, tc, t_hw)
    w = w_ref[0].astype(jnp.float32)
    img = img_ref[...].astype(jnp.float32)
    nse = noise_ref[...].astype(jnp.float32)        # broadcasts over axis 1
    out_ref[...] = (img + w * nse).astype(out_ref.dtype)


def _pick_tile(total, unit, cap):
    """Block length for an axis of size `total`.

    Returns either `total` itself (full extent, always a legal block dim) or
    the largest divisor of `total` that is a multiple of `unit` (satisfies the
    (8,128) tiling rule) and does not exceed `cap`.
    """
    if total <= cap:
        return total
    best = 0
    t = unit
    while t <= cap:
        if total % t == 0:
            best = t
        t += unit
    return best if best > 0 else total


def noise_forward(image, weight, key, *, max_hw_tile=16384, max_block_elems=512 * 1024):
    """image: (B, C, H, W); weight: (1,); key: PRNG key.

    max_hw_tile:     cap on the lane (H*W) block length (multiple of 128).
    max_block_elems: cap on elements per image/out block (~2 MiB in f32).
    """
    B, C, H, W = image.shape
    HW = H * W

    # noise has a single channel, broadcast over C
    # (matches image.new_empty(B, 1, H, W).normal_()).
    noise = jax.random.normal(key, (B, 1, H, W), dtype=image.dtype)

    # Lane-dense 3-D slabs: last dim H*W maps to lanes.
    img2 = image.reshape(B, C, HW)
    nse2 = noise.reshape(B, 1, HW)

    # Spatial (lane) tile: multiple of 128, as large as the cap allows.
    t_hw = _pick_tile(HW, 128, max_hw_tile)
    # Channel (sublane) tile: multiple of 8, bounded by the per-block budget.
    c_cap = max(8, max_block_elems // max(t_hw, 1))
    tc = _pick_tile(C, 8, c_cap)

    n_hw = HW // t_hw
    n_c = C // tc

    out = pl.pallas_call(
        _noise_kernel,
        out_shape=jax.ShapeDtypeStruct((B, C, HW), image.dtype),
        # C is the innermost axis so the noise block index (which ignores c)
        # is unchanged between consecutive steps -> no re-DMA of the noise.
        grid=(B, n_hw, n_c),
        in_specs=[
            pl.BlockSpec(memory_space=pltpu.MemorySpace.SMEM),            # weight scalar
            pl.BlockSpec((1, tc, t_hw), lambda b, hw, c: (b, c, hw)),     # image
            pl.BlockSpec((1, 1, t_hw), lambda b, hw, c: (b, 0, hw)),      # noise (C-resident)
        ],
        out_specs=pl.BlockSpec((1, tc, t_hw), lambda b, hw, c: (b, c, hw)),
        compiler_params=pltpu.CompilerParams(
            dimension_semantics=("parallel", "parallel", "arbitrary")),
    )(weight, img2, nse2)

    return out.reshape(B, C, H, W)


if __name__ == "__main__":
    key = jax.random.PRNGKey(0)
    k_img, k_noise, k_img2 = jax.random.split(key, 3)

    # Small shape consistent with the module.
    B, C, H, W = 2, 4, 16, 16
    image = jax.random.normal(k_img, (B, C, H, W), dtype=jnp.float32)

    # nn.Parameter(torch.zeros(1)) -> deterministic init; also use a non-zero
    # value so the noise path is actually exercised and checked.
    for w_val in (0.0, 0.37):
        weight = jnp.full((1,), w_val, dtype=jnp.float32)
        out = jax.block_until_ready(noise_forward(image, weight, k_noise))

        ref_noise = jax.random.normal(k_noise, (B, 1, H, W), dtype=jnp.float32)
        ref = image + weight[0] * ref_noise
        assert out.shape == (B, C, H, W)
        assert jnp.allclose(out, ref, atol=1e-6), f"mismatch at weight={w_val}"

    # Exercise the multi-tile path: grid > 1 along both HW and C, with the
    # noise tile kept resident across the inner C axis.
    B2, C2, H2, W2 = 2, 16, 16, 32
    image2 = jax.random.normal(k_img2, (B2, C2, H2, W2), dtype=jnp.float32)
    weight2 = jnp.full((1,), -1.25, dtype=jnp.float32)
    out2 = jax.block_until_ready(
        noise_forward(image2, weight2, k_noise,
                      max_hw_tile=128, max_block_elems=128 * 8))
    ref_noise2 = jax.random.normal(k_noise, (B2, 1, H2, W2), dtype=jnp.float32)
    ref2 = image2 + weight2[0] * ref_noise2
    assert out2.shape == (B2, C2, H2, W2)
    assert jnp.allclose(out2, ref2, atol=1e-6), "mismatch on tiled path"

    print("KERNEL_OK")
</pallas_src>

<mosaic_0001>
module attributes {stable_mosaic.version = 11 : i64} {
  func.func @_noise_kernel(%arg0: i32, %arg1: i32, %arg2: i32, %arg3: memref<1xf32, #tpu.memory_space<smem>>, %arg4: memref<1x4x256xf32, #tpu.memory_space<vmem>>, %arg5: memref<1x1x256xf32, #tpu.memory_space<vmem>>, %arg6: memref<1x4x256xf32, #tpu.memory_space<vmem>>) attributes {dimension_semantics = [#tpu.dimension_semantics<parallel>, #tpu.dimension_semantics<parallel>, #tpu.dimension_semantics<arbitrary>], iteration_bounds = array<i64: 2, 1, 1>, scalar_prefetch = 0 : i64, scratch_operands = 0 : i64, tpu.core_type = #tpu.core_type<tc>, window_params = [{transform_indices = @transform_0, window_bounds = array<i64: 1>}, {transform_indices = @transform_1, window_bounds = array<i64: 1, 4, 256>}, {transform_indices = @transform_2, window_bounds = array<i64: 1, 1, 256>}, {transform_indices = @transform_3, window_bounds = array<i64: 1, 4, 256>}]} {
    %c0 = arith.constant 0 : index
    %0 = memref.load %arg3[%c0] : memref<1xf32, #tpu.memory_space<smem>>
    %c0_0 = arith.constant 0 : index
    %c0_1 = arith.constant 0 : index
    %c0_2 = arith.constant 0 : index
    %1 = vector.load %arg4[%c0_0, %c0_1, %c0_2] : memref<1x4x256xf32, #tpu.memory_space<vmem>>, vector<1x4x256xf32>
    %c0_3 = arith.constant 0 : index
    %c0_4 = arith.constant 0 : index
    %c0_5 = arith.constant 0 : index
    %2 = vector.load %arg5[%c0_3, %c0_4, %c0_5] : memref<1x1x256xf32, #tpu.memory_space<vmem>>, vector<1x1x256xf32>
    %3 = vector.broadcast %0 : f32 to vector<1x1x256xf32>
    %4 = arith.mulf %3, %2 : vector<1x1x256xf32>
    %5 = vector.broadcast %4 : vector<1x1x256xf32> to vector<1x4x256xf32>
    %6 = arith.addf %1, %5 : vector<1x4x256xf32>
    %c0_6 = arith.constant 0 : index
    %c0_7 = arith.constant 0 : index
    %c0_8 = arith.constant 0 : index
    %7 = vector.load %arg6[%c0_6, %c0_7, %c0_8] : memref<1x4x256xf32, #tpu.memory_space<vmem>>, vector<1x4x256xf32>
    tpu.vector_store %arg6[%c0_6, %c0_7, %c0_8], %6 {strides = array<i32>} : memref<1x4x256xf32, #tpu.memory_space<vmem>>, vector<1x4x256xf32>,
    return
  }
  func.func @transform_0(%arg0: i32, %arg1: i32, %arg2: i32) -> i32 {
    %c0_i32 = arith.constant 0 : i32
    %c0_i32_0 = arith.constant 0 : i32
    return %c0_i32 : i32
  }
  func.func @transform_1(%arg0: i32, %arg1: i32, %arg2: i32) -> (i32, i32, i32) {
    %c0_i32 = arith.constant 0 : i32
    return %arg0, %arg2, %arg1 : i32, i32, i32
  }
  func.func @transform_2(%arg0: i32, %arg1: i32, %arg2: i32) -> (i32, i32, i32) {
    %c0_i32 = arith.constant 0 : i32
    %c0_i32_0 = arith.constant 0 : i32
    return %arg0, %c0_i32, %arg1 : i32, i32, i32
  }
  func.func @transform_3(%arg0: i32, %arg1: i32, %arg2: i32) -> (i32, i32, i32) {
    %c0_i32 = arith.constant 0 : i32
    return %arg0, %arg2, %arg1 : i32, i32, i32
  }
}

</mosaic_0001>

<bundles_post_ra>
// kernel: tpu_custom_call.1
= control target key start
LH: loop header
LB: loop body
LE: loop exit
PB: predicated region body
PF: predicated region fallthrough
CT: control target
= control target key end

     0   :  { %s839_s0 = inlined_call_operand.<no memory space> [shape: f32[1], index: 0, kind: input, shape index: {}]   ;;  %s840_s1 = inlined_call_operand.hbm [shape: f32[2,4,256], index: 1, kind: input, shape index: {}]   ;;  %s841_s2 = inlined_call_operand.hbm [shape: f32[2,1,256], index: 2, kind: input, shape index: {}]   ;;  %s842_s3 = inlined_call_operand.hbm [shape: f32[2,4,256], index: 3, kind: output, shape index: {}]  }
   0x1   :  { %8 = sst [smem:[#allocation2]] %s839_s0 }
   0x2   :  { %9 = vsyncpa [#allocation4], 0 }
   0x3   :  { %11 = vsyncpa [#allocation4 + $0x1], 0 }
   0x4   :  { %12 = vsyncpa [#allocation7], 0 }
   0x5   :  { %14 = vsyncpa [#allocation7 + $0x1], 0 }
   0x6   :  { %15 = vsyncpa [#allocation5], 0 }
   0x7   :  { %17 = vsyncpa [#allocation5 + $0x1], 0  ;;  %s675_s14 = smov 0   ;;  %s677_s15 = smov 0  }
   0x8   :  { %s679_s16 = smov 0   ;;  %s681_s17 = smov 0  }
   0x9   :  { %s683_s18 = smov 0   ;;  %s685_s19 = smov 0  }
   0xa LB: > { %s418_s0 = sadd.s32 4294967295, %s647_s19   ;;  %s419_s20 = sadd.s32 4294967294, %s647_s19   ;;  %s647_s19 = sphi %s685_s19, %s23_s19   ;;  %s643_s18 = sphi %s683_s18, %s854_s18   ;;  %s639_s17 = sphi %s681_s17, %s853_s17   ;;  %s635_s16 = sphi %s679_s16, %s852_s16   ;;  %s631_s15 = sphi %s677_s15, %s851_s15   ;;  %s627_s14 = sphi %s675_s14, %s850_s14  }
   0xb   : > { %s42_s21 = sadd.s32 1, %s643_s18  ;;  %s74_s22 = sadd.s32 1, %s635_s16 }
   0xc   : > { %p44_p0 = scmp.ge.s32.totalorder %s42_s21, 2  ;;  %p81_p1 = scmp.ne.s32.totalorder %s635_s16, %s631_s15 }
   0xd   : > { %p82_p2 = scmp.eq.s32.totalorder %s647_s19, 0  ;;  %p87_p3 = scmp.ne.s32.totalorder %s631_s15, %s627_s14 }
   0xe   : > { %s856_s21 = smov (%p44_p0, %s42_s21), 0  ;;  %p88_p5 = scmp.eq.s32.totalorder %s418_s0, 0 }
   0xf   : > { %p716_p4 = por %p82_p2, %p81_p1  ;;  %s67_s24 = ssub.s32 %s643_s18, %s856_s21 }
  0x10   : > { %p143_p6 = scmp.eq.s32.totalorder %s418_s0, 1  ;;  %p72_p7 = scmp.eq.s32.totalorder %s67_s24, 0 }
  0x11   : > { %p722_p8 = por %p88_p5, %p87_p3  ;;  %p149_p10 = scmp.eq.s32.totalorder %s419_s20, 1 }
  0x12   : > { %p726_p9 = por %p143_p6, %p81_p1  ;;  %p457_p13 = scmp.lt.s32.totalorder %s647_s19, 2 }
  0x13   : > { %s731_s27 = scalar_select %p72_p7, %s635_s16, %s74_s22  }
  0x14   : > { %p733_p11 = por %p149_p10, %p87_p3  ;;  %s740_s29 = sand.u32 1, %s635_s16  }
  0x15   : > { %s422_s30 = sshll.u32 %s740_s29, 3  ;;  %s437_s4 = sshll.u32 %s643_s18, 7 }
  0x16   : > { %s186_s7 = scalar_lea.hbm %s840_s1, %s437_s4  ;;  %s176_s8 = scalar_lea.vmem [#allocation3], %s422_s30 }
  0x17   : > { %s188_s9 = sshll.u32 %s176_s8, 4  ;;  %p749_p0 = pnand %p457_p13, %p716_p4  ;;  %s189_s9 = int_to_ptr.vmem [resolvable:$true] %s188_s9 }
  0x18   : > { %p428_p1 = scmp.ge.s32.totalorder %s647_s19, 1  ;;  %p214_p2 = scmp.lt.s32.totalorder %s647_s19, 3 }
  0x19   : > { %s173_s11 = scalar_lea.sflag [#allocation4], %s740_s29  ;;  %p509_p3 = pneg %p749_p0 }
  0x1a   : > { %s520_s12 = scalar_lea.vmem %s189_s9, 128  ;;  %s649_s13 = smov [#allocation3]  }
  0x1b   : > { %p521_p5 = scmp.ne.s32.totalorder %s189_s9, %s520_s12  ;;  %s525_s0 = sshll.u32 %s649_s13, 4  ;;  %s526_s0 = int_to_ptr.vmem [resolvable:$false] %s525_s0 }
  0x1c   : > { %s527_s20 = scalar_lea.vmem %s526_s0, 256  ;;  %p528_p4 = scmp.lt.s32.totalorder %s189_s9, %s526_s0 }
  0x1d   : > { %p523_p6 = pnand %p521_p5, %p509_p3  ;;  %p529_p10 = scmp.lt.s32.totalorder %s527_s20, %s520_s12 }
  0x1f   : > { %p524_p7 = pneg %p523_p6  ;;  %p530_p13 = por %p529_p10, %p528_p4 }
  0x21   : > { %p531_p12 = pnand %p530_p13, %p524_p7 }
  0x23   : > { %534 = shalt.err (!%p531_p12)
}
  0x24   : > { %449 = dma.hbm_to_vmem [thread:$0]  (!%p749_p0), %s186_s7, 128, %s189_s9, %s173_s11  }
  0x25   : > { %p767_p5 = pnand %p428_p1, %p214_p2  ;;  %s425_s23 = sshll.u32 %s740_s29, 1 }
  0x26   : > { %s438_s24 = sshll.u32 %s643_s18, 5  ;;  %s199_s6 = scalar_lea.vmem [#allocation6], %s425_s23 }
  0x27   : > { %s207_s5 = scalar_lea.hbm %s841_s2, %s438_s24  ;;  %s209_s8 = sshll.u32 %s199_s6, 4  ;;  %s210_s8 = int_to_ptr.vmem [resolvable:$true] %s209_s8 }
  0x28   : > { %s196_s12 = scalar_lea.sflag [#allocation7], %s740_s29  ;;  %s548_s13 = scalar_lea.vmem %s210_s8, 32 }
  0x29   : > { %p549_p12 = scmp.ne.s32.totalorder %s210_s8, %s548_s13  ;;  %s650_s7 = smov [#allocation6]  }
  0x2a   : > { %s553_s9 = sshll.u32 %s650_s7, 4  ;;  %s554_s9 = int_to_ptr.vmem [resolvable:$false] %s553_s9 }
  0x2b   : > { %p551_p6 = pnand %p549_p12, %p509_p3  ;;  %s555_s11 = scalar_lea.vmem %s554_s9, 64 }
  0x2c   : > { %p556_p1 = scmp.lt.s32.totalorder %s210_s8, %s554_s9  ;;  %p557_p2 = scmp.lt.s32.totalorder %s555_s11, %s548_s13 }
  0x2d   : > { %p552_p7 = pneg %p551_p6 }
  0x2e   : > { %p558_p4 = por %p557_p2, %p556_p1 }
  0x30   : > { %p559_p10 = pnand %p558_p4, %p552_p7 }
  0x32   : > { %562 = shalt.err (!%p559_p10)
}
  0x33   : > { %452 = dma.hbm_to_vmem [thread:$0]  (!%p749_p0), %s207_s5, 32, %s210_s8, %s196_s12  }
  0x34   : > { %218 = sbr.rel (%p767_p5) target bundleno = 89 (0x59), region = 32  ;;  %s785_s29 = sand.u32 (!%p767_p5), 1, %s631_s15  }
  0x35   : > { %s429_s0 = sshll.u32 (!%p767_p5), %s785_s29, 3  ;;  %s221_s20 = scalar_lea.sflag (!%p767_p5), [#allocation4], %s785_s29 }
  0x36   : > { %s224_s23 = scalar_lea.vmem (!%p767_p5), [#allocation3], %s429_s0 }
  0x39   : > { %614 = dma.done.wait (%p722_p8), %s221_s20, 128  }
  0x3a   : > { %616 = vsyncadd (%p722_p8), %s221_s20, 4294967168  ;;  %s430_s10 = sshll.u32 %s785_s29, 1  ;;  %s230_s22 = scalar_lea.sflag [#allocation7], %s785_s29 }
  0x3b   : > { %s233_s24 = scalar_lea.vmem [#allocation6], %s430_s10 }
  0x3c   : > { %618 = dma.done.wait (%p722_p8), %s230_s22, 32  }
  0x3d   : > { %620 = vsyncadd (%p722_p8), %s230_s22, 4294967264  ;;  %v270_v0 = vlaneseq  ;;  %s264_s30 = sld [smem:[#allocation2]]  ;;  %v266_v4 = vld [vmem:[%s233_s24] sm:$0x3]  ;;  %v265_v9 = vld [vmem:[%s224_s23] sm:$0xff]  ;;  %s260_s4 = scalar_lea.vmem [#allocation8], %s429_s0 }
  0x3e   : > { %s301_s5 = sshll.u32 %s260_s4, 4  ;;  %s439_s6 = sshll.u32 %s639_s17, 7  ;;  %s302_s5 = int_to_ptr.vmem [resolvable:$true] %s301_s5 }
  0x3f   : > { %v271_v1 = vshrl.u32 %v270_v0, 7  ;;  %s299_s12 = scalar_lea.hbm %s842_s3, %s439_s6  ;;  %s283_s13 = scalar_lea.sflag [#allocation5], %s785_s29 }
  0x40   : > { %s563_s7 = scalar_lea.vmem %s302_s5, 128  ;;  %s651_s9 = smov [#allocation8]  }
  0x41   : > { %v272_v2 = vsub.s32 0, %v271_v1  ;;  %v276_v3 = vsub.s32 1, %v271_v1  ;;  %p564_p8 = scmp.ne.s32.totalorder %s302_s5, %s563_s7  ;;  %s567_s11 = sshll.u32 %s651_s9, 4  ;;  %s568_s11 = int_to_ptr.vmem [resolvable:$false] %s567_s11 }
  0x42   : > { %s569_s0 = scalar_lea.vmem %s568_s11, 256  ;;  %p570_p13 = scmp.lt.s32.totalorder %s302_s5, %s568_s11 }
  0x43   : > { %v267_v5 = vstv %s264_s30  ;;  %p565_p0 = pnand %p564_p8, %p726_p9  ;;  %p571_p5 = scmp.lt.s32.totalorder %s569_s0, %s563_s7 }
  0x44   : > { %v268_v6 = vmul.f32 %v267_v5, %v266_v4 }
  0x45   : > { %p566_p3 = pneg %p565_p0  ;;  %p572_p12 = por %p571_p5, %p570_p13 }
  0x46   : > { %v273_v7 = vrot.slane %v268_v6, %v272_v2  ;;  %v277_v8 = vrot.slane %v268_v6, %v276_v3 }
  0x47   : > { %p573_p6 = pnand %p572_p12, %p566_p3 }
  0x48   : > { %v278_v10 = vcombine.low %v273_v7, %v277_v8 }
  0x4a   : > { %v280_v11 = vadd.f32 %v278_v10, %v265_v9 }
  0x4c   : > { %281 = vst [vmem:[%s260_s4] sm:$0xff] %v280_v11 }
  0x4d   : > { %576 = shalt.err (!%p573_p6)
}
  0x4e   : > { %s577_s17 = scalar_lea.hbm %s299_s12, 128  ;;  %s581_s23 = scalar_lea.hbm %s842_s3, 256 }
  0x4f   : > { %p578_p7 = scmp.ne.s32.totalorder %s299_s12, %s577_s17  ;;  %p582_p4 = scmp.lt.s32.totalorder %s299_s12, %s842_s3 }
  0x50   : > { %p583_p10 = scmp.lt.s32.totalorder %s581_s23, %s577_s17 }
  0x51   : > { %p579_p1 = pnand %p578_p7, %p726_p9 }
  0x52   : > { %p584_p8 = por %p583_p10, %p582_p4 }
  0x53   : > { %p580_p2 = pneg %p579_p1 }
  0x55   : > { %p585_p0 = pnand %p584_p8, %p580_p2 }
  0x57   : > { %588 = shalt.err (!%p585_p0)
}
  0x58   : > { %444 = dma.vmem_to_hbm [thread:$0]  (%p726_p9), %s302_s5, 128, %s299_s12, %s283_s13  }
  0x59 PF: > { %s313_s24 = sand.u32 1, %s627_s14   ;;  %p849_p3 = scmp.ge.s32.totalorder %s647_s19, 2 }
  0x5a   : > { %s314_s30 = scalar_lea.sflag [#allocation5], %s313_s24 }
  0x5b   : > { %p454_p13 = pnand %p849_p3, %p733_p11 }
  0x5d   : > { %p455_p5 = pneg %p454_p13 }
  0x5f   : > { %622 = dma.done.wait (%p455_p5), %s314_s30, 128  }
  0x60   : > { %624 = vsyncadd (%p455_p5), %s314_s30, 4294967168  ;;  %s23_s19 = sadd.s32 1, %s647_s19   ;;  %s850_s14 = smov %s631_s15 }
  0x61   : > { %p20_p12 = scmp.ge.s32.totalorder %s23_s19, 4   ;;  %s851_s15 = smov %s635_s16 }
  0x62   : > { %s852_s16 = smov %s731_s27  ;;  %s853_s17 = smov %s643_s18 }
  0x63   : > { %s854_s18 = smov %s856_s21  ;;  %22 = sbr.rel (!%p20_p12) target bundleno = 10 (0xa), region = 90 }
  0x68   :  { %319 = vsyncpa [#allocation4], 1 }
  0x69   :  { %321 = vsyncpa [#allocation4 + $0x1], 1 }
  0x6a   :  { %322 = vsyncpa [#allocation7], 1 }
  0x6b   :  { %324 = vsyncpa [#allocation7 + $0x1], 1 }
  0x6c   :  { %325 = vsyncpa [#allocation5], 1 }
  0x6d   :  { %327 = vsyncpa [#allocation5 + $0x1], 1 }

</bundles_post_ra>
